<compile_context>
chip_gen: v7x
topology: tpu7x:2x2x1
jax: 0.10.0
libtpu: 0.0.40
codegen_flags: <defaults>
</compile_context>

<pallas_src>
import functools

import numpy as np
import jax
import jax.numpy as jnp
from jax.experimental import pallas as pl
from jax.experimental.pallas import tpu as pltpu


def _round_up(v, k):
    return ((v + k - 1) // k) * k


def _band_fill_kernel(offdiag_ref, diag_ref, o_ref, *, n_off, tm, tn):
    """N >= 2 path: output is a pure parameter band matrix, independent of x."""
    # Global (j - i) at the tile origin.
    base = pl.program_id(1) * tn - pl.program_id(0) * tm

    # Does this tile intersect the band |j - i| <= n_off - 1 ?
    max_diff = base + (tn - 1)
    min_diff = base - (tm - 1)
    has_band = jnp.logical_and(max_diff >= -(n_off - 1), min_diff <= (n_off - 1))

    @pl.when(jnp.logical_not(has_band))
    def _():
        # Fast path for fully off-band tiles: pure memset, no VALU select work.
        o_ref[...] = jnp.zeros_like(o_ref)

    @pl.when(has_band)
    def _():
        row = jax.lax.broadcasted_iota(jnp.int32, (tm, tn), 0)   # local i
        col = jax.lax.broadcasted_iota(jnp.int32, (tm, tn), 1)   # local j
        diff = (col - row) + base                                # global j - i

        # Start from zeros (off-band region inside a band tile stays zero) and
        # overwrite each populated diagonal; the +/-d diagonals are disjoint so
        # the select ordering matches the PyTorch loop exactly.
        out = jnp.zeros((tm, tn), o_ref.dtype)
        out = jnp.where(diff == 0, diag_ref[0], out)             # main diagonal (N >= 2)
        for d in range(1, n_off):
            out = jnp.where(diff == d, offdiag_ref[d], out)
            out = jnp.where(diff == -d, offdiag_ref[d + n_off], out)
        o_ref[...] = out


def _diag_only_kernel(x_ref, o_ref, *, tm, tn):
    """N == 1 edge case: range(1, 1) is empty, so no parameter writes happen.
    The masking steps leave only the main diagonal of x; everything else is zero."""
    base = pl.program_id(1) * tn - pl.program_id(0) * tm
    row = jax.lax.broadcasted_iota(jnp.int32, (tm, tn), 0)
    col = jax.lax.broadcasted_iota(jnp.int32, (tm, tn), 1)
    diff = (col - row) + base
    o_ref[...] = jnp.where(diff == 0, x_ref[...], jnp.zeros_like(o_ref))


def shared_weight_forward(x, offdiag, diag, n_off, *, tm=512, tn=512):
    """Pallas equivalent of sharedWeightLayer.forward (float32)."""
    m, n = x.shape
    assert m == n, "forward assumes a square matrix (i, j loop over both dims)"

    # Clamp tile sizes for small inputs while keeping (8, 128) alignment and a
    # lane-dense (multiple-of-128) output last dim.
    tm = max(8, min(tm, _round_up(m, 8)))
    tn = max(128, min(tn, _round_up(n, 128)))
    grid = (pl.cdiv(m, tm), pl.cdiv(n, tn))

    out_shape = jax.ShapeDtypeStruct((m, n), x.dtype)
    out_spec = pl.BlockSpec((tm, tn), lambda i, j: (i, j))
    params = pltpu.CompilerParams(dimension_semantics=("parallel", "parallel"))

    if n_off >= 2:
        kernel = functools.partial(_band_fill_kernel, n_off=n_off, tm=tm, tn=tn)
        return pl.pallas_call(
            kernel,
            out_shape=out_shape,
            grid=grid,
            in_specs=[
                pl.BlockSpec(memory_space=pltpu.MemorySpace.SMEM),  # OffDiagonalValues (2N,)
                pl.BlockSpec(memory_space=pltpu.MemorySpace.SMEM),  # Diag (1,)
            ],
            out_specs=out_spec,
            compiler_params=params,
        )(offdiag, diag)   # x intentionally NOT passed: result is independent of it

    # n_off == 1: only this path reads x.
    kernel = functools.partial(_diag_only_kernel, tm=tm, tn=tn)
    return pl.pallas_call(
        kernel,
        out_shape=out_shape,
        grid=grid,
        in_specs=[pl.BlockSpec((tm, tn), lambda i, j: (i, j))],
        out_specs=out_spec,
        compiler_params=params,
    )(x)


def _reference_numpy(x, offdiag, diag, n_off):
    """Vectorized transcription of the PyTorch forward, for verification."""
    x = np.array(x, dtype=np.float32, copy=True)
    m, _ = x.shape
    ii, jj = np.indices((m, m))
    diff = jj - ii
    x[np.abs(diff) >= n_off] = 0.0
    for d in range(1, n_off):
        x[diff == d] = offdiag[d]
        x[diff == -d] = offdiag[d + n_off]
    if n_off >= 2:  # matches range(1, n_off): diagonal only touched when N >= 2
        x[diff == 0] = diag[0]
    return x


if __name__ == "__main__":
    key = jax.random.PRNGKey(0)
    kx, ko, kd = jax.random.split(key, 3)

    n_off = 10  # noOfOffDiagValues (module default)
    offdiag = jax.random.normal(ko, (2 * n_off,), dtype=jnp.float32)  # OffDiagonalValues
    diag = jax.random.normal(kd, (1,), dtype=jnp.float32)             # Diag
    # TODO(synk): __init__'s _DerivMatrix / Taustarlist / torch.logspace buffers are
    # never used in forward(); they are intentionally not materialized here.

    # Case 1: small square input (stand-in for CA1Size), single band tile.
    M1 = 64
    x1 = jax.random.normal(kx, (M1, M1), dtype=jnp.float32)
    out1 = jax.block_until_ready(shared_weight_forward(x1, offdiag, diag, n_off))
    ref1 = _reference_numpy(np.asarray(x1), np.asarray(offdiag), np.asarray(diag), n_off)
    np.testing.assert_allclose(np.asarray(out1), ref1, rtol=1e-6, atol=1e-6)

    # Case 2: multi-tile grid (3x3), exercises the off-band fast path and block padding.
    M2 = 640
    x2 = jax.random.normal(kx, (M2, M2), dtype=jnp.float32)
    out2 = jax.block_until_ready(
        shared_weight_forward(x2, offdiag, diag, n_off, tm=256, tn=256))
    ref2 = _reference_numpy(np.asarray(x2), np.asarray(offdiag), np.asarray(diag), n_off)
    np.testing.assert_allclose(np.asarray(out2), ref2, rtol=1e-6, atol=1e-6)

    # Case 3: n_off == 1 edge case (no parameter writes; result is diag(x)).
    out3 = jax.block_until_ready(shared_weight_forward(x1, offdiag[:2], diag, 1))
    ref3 = _reference_numpy(np.asarray(x1), np.asarray(offdiag[:2]), np.asarray(diag), 1)
    np.testing.assert_allclose(np.asarray(out3), ref3, rtol=1e-6, atol=1e-6)

    print("KERNEL_OK")
</pallas_src>

<mosaic_0001>
module attributes {stable_mosaic.version = 11 : i64} {
  func.func @_band_fill_kernel(%arg0: i32, %arg1: i32, %arg2: memref<20xf32, #tpu.memory_space<smem>>, %arg3: memref<1xf32, #tpu.memory_space<smem>>, %arg4: memref<64x128xf32, #tpu.memory_space<vmem>>) attributes {dimension_semantics = [#tpu.dimension_semantics<parallel>, #tpu.dimension_semantics<parallel>], iteration_bounds = array<i64: 1, 1>, scalar_prefetch = 0 : i64, scratch_operands = 0 : i64, tpu.core_type = #tpu.core_type<tc>, window_params = [{transform_indices = @transform_0, window_bounds = array<i64: 20>}, {transform_indices = @transform_1, window_bounds = array<i64: 1>}, {transform_indices = @transform_2, window_bounds = array<i64: 64, 128>}]} {
    %c128_i32 = arith.constant 128 : i32
    %0 = arith.muli %arg1, %c128_i32 : i32
    %c64_i32 = arith.constant 64 : i32
    %1 = arith.muli %arg0, %c64_i32 : i32
    %2 = arith.subi %0, %1 : i32
    %c127_i32 = arith.constant 127 : i32
    %3 = arith.addi %2, %c127_i32 : i32
    %c63_i32 = arith.constant 63 : i32
    %4 = arith.subi %2, %c63_i32 : i32
    %c-9_i32 = arith.constant -9 : i32
    %5 = arith.cmpi sge, %3, %c-9_i32 : i32
    %c9_i32 = arith.constant 9 : i32
    %6 = arith.cmpi sle, %4, %c9_i32 : i32
    %7 = arith.andi %5, %6 : i1
    %true = arith.constant true
    %8 = arith.xori %7, %true : i1
    %9 = arith.extui %8 : i1 to i32
    %c0_i32 = arith.constant 0 : i32
    %10 = arith.cmpi ne, %9, %c0_i32 : i32
    scf.if %10 {
      %cst = arith.constant 0.000000e+00 : f32
      %13 = vector.broadcast %cst : f32 to vector<64x128xf32>
      %c0 = arith.constant 0 : index
      %c0_1 = arith.constant 0 : index
      %14 = vector.load %arg4[%c0, %c0_1] : memref<64x128xf32, #tpu.memory_space<vmem>>, vector<64x128xf32>
      tpu.vector_store %arg4[%c0, %c0_1], %13 {strides = array<i32>} : memref<64x128xf32, #tpu.memory_space<vmem>>, vector<64x128xf32>,
    } else {
    }
    %11 = arith.extui %7 : i1 to i32
    %c0_i32_0 = arith.constant 0 : i32
    %12 = arith.cmpi ne, %11, %c0_i32_0 : i32
    scf.if %12 {
      %13 = tpu.iota {dimensions = array<i32: 0>} : vector<64x128xi32>
      %14 = tpu.iota {dimensions = array<i32: 1>} : vector<64x128xi32>
      %15 = arith.subi %14, %13 : vector<64x128xi32>
      %16 = vector.broadcast %2 : i32 to vector<64x128xi32>
      %17 = arith.addi %15, %16 : vector<64x128xi32>
      %cst = arith.constant 0.000000e+00 : f32
      %18 = vector.broadcast %cst : f32 to vector<64x128xf32>
      %c0_i32_1 = arith.constant 0 : i32
      %19 = vector.broadcast %c0_i32_1 : i32 to vector<64x128xi32>
      %20 = arith.cmpi eq, %17, %19 : vector<64x128xi32>
      %c0 = arith.constant 0 : index
      %21 = memref.load %arg3[%c0] : memref<1xf32, #tpu.memory_space<smem>>
      %22 = vector.broadcast %21 : f32 to vector<64x128xf32>
      %23 = arith.select %20, %22, %18 : vector<64x128xi1>, vector<64x128xf32>
      %c1_i32 = arith.constant 1 : i32
      %24 = vector.broadcast %c1_i32 : i32 to vector<64x128xi32>
      %25 = arith.cmpi eq, %17, %24 : vector<64x128xi32>
      %c1 = arith.constant 1 : index
      %26 = memref.load %arg2[%c1] : memref<20xf32, #tpu.memory_space<smem>>
      %27 = vector.broadcast %26 : f32 to vector<64x128xf32>
      %28 = arith.select %25, %27, %23 : vector<64x128xi1>, vector<64x128xf32>
      %c-1_i32 = arith.constant -1 : i32
      %29 = vector.broadcast %c-1_i32 : i32 to vector<64x128xi32>
      %30 = arith.cmpi eq, %17, %29 : vector<64x128xi32>
      %c11 = arith.constant 11 : index
      %31 = memref.load %arg2[%c11] : memref<20xf32, #tpu.memory_space<smem>>
      %32 = vector.broadcast %31 : f32 to vector<64x128xf32>
      %33 = arith.select %30, %32, %28 : vector<64x128xi1>, vector<64x128xf32>
      %c2_i32 = arith.constant 2 : i32
      %34 = vector.broadcast %c2_i32 : i32 to vector<64x128xi32>
      %35 = arith.cmpi eq, %17, %34 : vector<64x128xi32>
      %c2 = arith.constant 2 : index
      %36 = memref.load %arg2[%c2] : memref<20xf32, #tpu.memory_space<smem>>
      %37 = vector.broadcast %36 : f32 to vector<64x128xf32>
      %38 = arith.select %35, %37, %33 : vector<64x128xi1>, vector<64x128xf32>
      %c-2_i32 = arith.constant -2 : i32
      %39 = vector.broadcast %c-2_i32 : i32 to vector<64x128xi32>
      %40 = arith.cmpi eq, %17, %39 : vector<64x128xi32>
      %c12 = arith.constant 12 : index
      %41 = memref.load %arg2[%c12] : memref<20xf32, #tpu.memory_space<smem>>
      %42 = vector.broadcast %41 : f32 to vector<64x128xf32>
      %43 = arith.select %40, %42, %38 : vector<64x128xi1>, vector<64x128xf32>
      %c3_i32 = arith.constant 3 : i32
      %44 = vector.broadcast %c3_i32 : i32 to vector<64x128xi32>
      %45 = arith.cmpi eq, %17, %44 : vector<64x128xi32>
      %c3 = arith.constant 3 : index
      %46 = memref.load %arg2[%c3] : memref<20xf32, #tpu.memory_space<smem>>
      %47 = vector.broadcast %46 : f32 to vector<64x128xf32>
      %48 = arith.select %45, %47, %43 : vector<64x128xi1>, vector<64x128xf32>
      %c-3_i32 = arith.constant -3 : i32
      %49 = vector.broadcast %c-3_i32 : i32 to vector<64x128xi32>
      %50 = arith.cmpi eq, %17, %49 : vector<64x128xi32>
      %c13 = arith.constant 13 : index
      %51 = memref.load %arg2[%c13] : memref<20xf32, #tpu.memory_space<smem>>
      %52 = vector.broadcast %51 : f32 to vector<64x128xf32>
      %53 = arith.select %50, %52, %48 : vector<64x128xi1>, vector<64x128xf32>
      %c4_i32 = arith.constant 4 : i32
      %54 = vector.broadcast %c4_i32 : i32 to vector<64x128xi32>
      %55 = arith.cmpi eq, %17, %54 : vector<64x128xi32>
      %c4 = arith.constant 4 : index
      %56 = memref.load %arg2[%c4] : memref<20xf32, #tpu.memory_space<smem>>
      %57 = vector.broadcast %56 : f32 to vector<64x128xf32>
      %58 = arith.select %55, %57, %53 : vector<64x128xi1>, vector<64x128xf32>
      %c-4_i32 = arith.constant -4 : i32
      %59 = vector.broadcast %c-4_i32 : i32 to vector<64x128xi32>
      %60 = arith.cmpi eq, %17, %59 : vector<64x128xi32>
      %c14 = arith.constant 14 : index
      %61 = memref.load %arg2[%c14] : memref<20xf32, #tpu.memory_space<smem>>
      %62 = vector.broadcast %61 : f32 to vector<64x128xf32>
      %63 = arith.select %60, %62, %58 : vector<64x128xi1>, vector<64x128xf32>
      %c5_i32 = arith.constant 5 : i32
      %64 = vector.broadcast %c5_i32 : i32 to vector<64x128xi32>
      %65 = arith.cmpi eq, %17, %64 : vector<64x128xi32>
      %c5 = arith.constant 5 : index
      %66 = memref.load %arg2[%c5] : memref<20xf32, #tpu.memory_space<smem>>
      %67 = vector.broadcast %66 : f32 to vector<64x128xf32>
      %68 = arith.select %65, %67, %63 : vector<64x128xi1>, vector<64x128xf32>
      %c-5_i32 = arith.constant -5 : i32
      %69 = vector.broadcast %c-5_i32 : i32 to vector<64x128xi32>
      %70 = arith.cmpi eq, %17, %69 : vector<64x128xi32>
      %c15 = arith.constant 15 : index
      %71 = memref.load %arg2[%c15] : memref<20xf32, #tpu.memory_space<smem>>
      %72 = vector.broadcast %71 : f32 to vector<64x128xf32>
      %73 = arith.select %70, %72, %68 : vector<64x128xi1>, vector<64x128xf32>
      %c6_i32 = arith.constant 6 : i32
      %74 = vector.broadcast %c6_i32 : i32 to vector<64x128xi32>
      %75 = arith.cmpi eq, %17, %74 : vector<64x128xi32>
      %c6 = arith.constant 6 : index
      %76 = memref.load %arg2[%c6] : memref<20xf32, #tpu.memory_space<smem>>
      %77 = vector.broadcast %76 : f32 to vector<64x128xf32>
      %78 = arith.select %75, %77, %73 : vector<64x128xi1>, vector<64x128xf32>
      %c-6_i32 = arith.constant -6 : i32
      %79 = vector.broadcast %c-6_i32 : i32 to vector<64x128xi32>
      %80 = arith.cmpi eq, %17, %79 : vector<64x128xi32>
      %c16 = arith.constant 16 : index
      %81 = memref.load %arg2[%c16] : memref<20xf32, #tpu.memory_space<smem>>
      %82 = vector.broadcast %81 : f32 to vector<64x128xf32>
      %83 = arith.select %80, %82, %78 : vector<64x128xi1>, vector<64x128xf32>
      %c7_i32 = arith.constant 7 : i32
      %84 = vector.broadcast %c7_i32 : i32 to vector<64x128xi32>
      %85 = arith.cmpi eq, %17, %84 : vector<64x128xi32>
      %c7 = arith.constant 7 : index
      %86 = memref.load %arg2[%c7] : memref<20xf32, #tpu.memory_space<smem>>
      %87 = vector.broadcast %86 : f32 to vector<64x128xf32>
      %88 = arith.select %85, %87, %83 : vector<64x128xi1>, vector<64x128xf32>
      %c-7_i32 = arith.constant -7 : i32
      %89 = vector.broadcast %c-7_i32 : i32 to vector<64x128xi32>
      %90 = arith.cmpi eq, %17, %89 : vector<64x128xi32>
      %c17 = arith.constant 17 : index
      %91 = memref.load %arg2[%c17] : memref<20xf32, #tpu.memory_space<smem>>
      %92 = vector.broadcast %91 : f32 to vector<64x128xf32>
      %93 = arith.select %90, %92, %88 : vector<64x128xi1>, vector<64x128xf32>
      %c8_i32 = arith.constant 8 : i32
      %94 = vector.broadcast %c8_i32 : i32 to vector<64x128xi32>
      %95 = arith.cmpi eq, %17, %94 : vector<64x128xi32>
      %c8 = arith.constant 8 : index
      %96 = memref.load %arg2[%c8] : memref<20xf32, #tpu.memory_space<smem>>
      %97 = vector.broadcast %96 : f32 to vector<64x128xf32>
      %98 = arith.select %95, %97, %93 : vector<64x128xi1>, vector<64x128xf32>
      %c-8_i32 = arith.constant -8 : i32
      %99 = vector.broadcast %c-8_i32 : i32 to vector<64x128xi32>
      %100 = arith.cmpi eq, %17, %99 : vector<64x128xi32>
      %c18 = arith.constant 18 : index
      %101 = memref.load %arg2[%c18] : memref<20xf32, #tpu.memory_space<smem>>
      %102 = vector.broadcast %101 : f32 to vector<64x128xf32>
      %103 = arith.select %100, %102, %98 : vector<64x128xi1>, vector<64x128xf32>
      %c9_i32_2 = arith.constant 9 : i32
      %104 = vector.broadcast %c9_i32_2 : i32 to vector<64x128xi32>
      %105 = arith.cmpi eq, %17, %104 : vector<64x128xi32>
      %c9 = arith.constant 9 : index
      %106 = memref.load %arg2[%c9] : memref<20xf32, #tpu.memory_space<smem>>
      %107 = vector.broadcast %106 : f32 to vector<64x128xf32>
      %108 = arith.select %105, %107, %103 : vector<64x128xi1>, vector<64x128xf32>
      %c-9_i32_3 = arith.constant -9 : i32
      %109 = vector.broadcast %c-9_i32_3 : i32 to vector<64x128xi32>
      %110 = arith.cmpi eq, %17, %109 : vector<64x128xi32>
      %c19 = arith.constant 19 : index
      %111 = memref.load %arg2[%c19] : memref<20xf32, #tpu.memory_space<smem>>
      %112 = vector.broadcast %111 : f32 to vector<64x128xf32>
      %113 = arith.select %110, %112, %108 : vector<64x128xi1>, vector<64x128xf32>
      %c0_4 = arith.constant 0 : index
      %c0_5 = arith.constant 0 : index
      %114 = vector.load %arg4[%c0_4, %c0_5] : memref<64x128xf32, #tpu.memory_space<vmem>>, vector<64x128xf32>
      tpu.vector_store %arg4[%c0_4, %c0_5], %113 {strides = array<i32>} : memref<64x128xf32, #tpu.memory_space<vmem>>, vector<64x128xf32>,
    } else {
    }
    return
  }
  func.func @transform_0(%arg0: i32, %arg1: i32) -> i32 {
    %c0_i32 = arith.constant 0 : i32
    %c0_i32_0 = arith.constant 0 : i32
    return %c0_i32 : i32
  }
  func.func @transform_1(%arg0: i32, %arg1: i32) -> i32 {
    %c0_i32 = arith.constant 0 : i32
    %c0_i32_0 = arith.constant 0 : i32
    return %c0_i32 : i32
  }
  func.func @transform_2(%arg0: i32, %arg1: i32) -> (i32, i32) {
    %c0_i32 = arith.constant 0 : i32
    return %arg0, %arg1 : i32, i32
  }
}

</mosaic_0001>

<bundles_post_ra>
// kernel: tpu_custom_call.1
= control target key start
LH: loop header
LB: loop body
LE: loop exit
PB: predicated region body
PF: predicated region fallthrough
CT: control target
= control target key end

     0   :  { %8 = vsyncpa [#allocation5], 0  ;;  %s997_s0 = inlined_call_operand.vmem [shape: f32[20], index: 0, kind: input, shape index: {}]   ;;  %s998_s1 = inlined_call_operand.<no memory space> [shape: f32[1], index: 1, kind: input, shape index: {}]   ;;  %s999_s2 = inlined_call_operand.hbm [shape: f32[64,64], index: 2, kind: output, shape index: {}]  }
   0x1   :  { %9 = vsyncpa [#allocation4], 0  ;;  %s16_s11 = sshll.u32 %s997_s0, 4  ;;  %s17_s11 = int_to_ptr.vmem [resolvable:$true] %s16_s11 }
   0x2   :  { %s465_s12 = scalar_lea.vmem %s17_s11, 16  ;;  %p470_p1 = scmp.lt.s32.totalorder %s17_s11, %s17_s11 }
   0x3   :  { %p466_p0 = scmp.ne.s32.totalorder %s17_s11, %s465_s12  ;;  %p471_p2 = scmp.lt.s32.totalorder %s465_s12, %s465_s12 }
   0x5   :  { %p472_p3 = por %p471_p2, %p470_p1 }
   0x7   :  { %p473_p4 = pnand %p472_p3, %p466_p0 }
   0x9   :  { %476 = shalt.err (!%p473_p4)
}
   0xa   :  { %s503_s13 = smov [#allocation3]  }
   0xb   :  { %19 = dma.vmem_to_smem %s17_s11, 16, %s503_s13, [#allocation5]  }
   0xc   :  { %499 = dma.done.wait [#allocation5], 16  }
   0xd   :  { %500 = vsyncadd [#allocation5], 4294967280 }
   0xe   :  { %25 = sfence }
   0xf   :  { %v37_v0 = vlaneseq  ;;  %s443_s14 = sld [smem:[#allocation3 + $0x1]]  ;;  %s444_s15 = sld [smem:[#allocation3 + $0xb]]  ;;  %v547_v4 = vstv %s998_s1 }
  0x10   :  { %s445_s16 = sld [smem:[#allocation3 + $0x2]]  ;;  %s446_s0 = sld [smem:[#allocation3 + $0xc]] }
  0x11   :  { %v525_v1 = vshrl.u32 %v37_v0, 7  ;;  %v527_v2 = vand.u32 127, %v37_v0  ;;  %s529_s17 = sld [smem:[#allocation3 + $0x3]]  ;;  %s535_s18 = sld [smem:[#allocation3 + $0xd]] }
  0x12   :  { %s537_s19 = sld [smem:[#allocation3 + $0x4]]  ;;  %s539_s20 = sld [smem:[#allocation3 + $0xe]] }
  0x13   :  { %v533_v3 = vsub.s32 %v527_v2, %v525_v1  ;;  %s541_s21 = sld [smem:[#allocation3 + $0x5]]  ;;  %s551_s24 = sld [smem:[#allocation3 + $0xf]]  ;;  %v39_v9 = vadd.s32 8, %v525_v1  ;;  %v40_v12 = vadd.s32 16, %v525_v1  ;;  %v580_v15 = vadd.s32 24, %v525_v1 }
  0x14   :  { %s557_s25 = sld [smem:[#allocation3 + $0x6]]  ;;  %s559_s26 = sld [smem:[#allocation3 + $0x10]]  ;;  %v588_v18 = vadd.s32 32, %v525_v1 }
  0x15   :  { %vm65_vm0 = vcmp.eq.s32.totalorder %v533_v3, 0  ;;  %vm83_vm1 = vcmp.eq.s32.totalorder %v533_v3, 1  ;;  %vm101_vm2 = vcmp.eq.s32.totalorder %v533_v3, 4294967295  ;;  %v554_v6 = vstv %s443_s14  ;;  %s565_s1 = sld [smem:[#allocation3 + $0x7]]  ;;  %s572_s27 = sld [smem:[#allocation3 + $0x11]] }
  0x16   :  { %v75_v5 = vsel %vm65_vm0, %v547_v4, 0.0  ;;  %vm119_vm3 = vcmp.eq.s32.totalorder %v533_v3, 2  ;;  %v562_v8 = vstv %s444_s15  ;;  %vm137_vm4 = vcmp.eq.s32.totalorder %v533_v3, 4294967294  ;;  %s598_s28 = sld [smem:[#allocation3 + $0x9]]  ;;  %s608_s29 = sld [smem:[#allocation3 + $0x8]] }
  0x17   :  { %v93_v7 = vsel %vm83_vm1, %v554_v6, %v75_v5  ;;  %v569_v11 = vstv %s445_s16  ;;  %vm155_vm5 = vcmp.eq.s32.totalorder %v533_v3, 3  ;;  %v576_v14 = vstv %s446_s0  ;;  %s624_s30 = sld [smem:[#allocation3 + $0x12]]  ;;  %s634_s3 = sld [smem:[#allocation3 + $0x13]] }
  0x18   :  { %v111_v10 = vsel %vm101_vm2, %v562_v8, %v93_v7  ;;  %vm173_vm6 = vcmp.eq.s32.totalorder %v533_v3, 4294967293  ;;  %v584_v17 = vstv %s529_s17  ;;  %vm191_vm7 = vcmp.eq.s32.totalorder %v533_v3, 4  ;;  %s504_s4 = smov [#allocation6]  }
  0x19   :  { %v129_v13 = vsel %vm119_vm3, %v569_v11, %v111_v10  ;;  %v592_v20 = vstv %s535_s18  ;;  %v595_v21 = vstv %s537_s19  ;;  %vm209_vm8 = vcmp.eq.s32.totalorder %v533_v3, 4294967292  ;;  %s431_s5 = sshll.u32 %s504_s4, 4  ;;  %s432_s5 = int_to_ptr.vmem [resolvable:$true] %s431_s5 }
  0x1a   :  { %v147_v16 = vsel %vm137_vm4, %v576_v14, %v129_v13  ;;  %v602_v23 = vstv %s539_s20  ;;  %vm227_vm9 = vcmp.eq.s32.totalorder %v533_v3, 5  ;;  %v606_v24 = vstv %s541_s21  ;;  %s477_s6 = scalar_lea.vmem %s432_s5, 1024  ;;  %p482_p6 = scmp.lt.s32.totalorder %s432_s5, %s432_s5 }
  0x1b   :  { %v165_v19 = vsel %vm155_vm5, %v584_v17, %v147_v16  ;;  %vm245_vm10 = vcmp.eq.s32.totalorder %v533_v3, 4294967291  ;;  %v613_v26 = vstv %s551_s24  ;;  %vm263_vm11 = vcmp.eq.s32.totalorder %v533_v3, 6  ;;  %p478_p5 = scmp.ne.s32.totalorder %s432_s5, %s477_s6  ;;  %p483_p7 = scmp.lt.s32.totalorder %s477_s6, %s477_s6 }
  0x1c   :  { %v183_v22 = vsel %vm173_vm6, %v592_v20, %v165_v19  ;;  %v618_v28 = vstv %s557_s25  ;;  %vm281_vm12 = vcmp.eq.s32.totalorder %v533_v3, 4294967290  ;;  %v622_v29 = vstv %s559_s26 }
  0x1d   :  { %v201_v25 = vsel %vm191_vm7, %v595_v21, %v183_v22  ;;  %vm299_vm13 = vcmp.eq.s32.totalorder %v533_v3, 7  ;;  %v629_v31 = vstv %s565_s1  ;;  %v632_v32 = vsub.s32 %v527_v2, %v39_v9  ;;  %p484_p8 = por %p483_p7, %p482_p6 }
  0x1e   :  { %v219_v27 = vsel %vm209_vm8, %v602_v23, %v201_v25  ;;  %vm317_vm14 = vcmp.eq.s32.totalorder %v533_v3, 4294967289  ;;  %v639_v34 = vstv %s572_s27  ;;  %vm335_vm15 = vcmp.eq.s32.totalorder %v533_v3, 8 }
  0x1f   :  { %v237_v30 = vsel %vm227_vm9, %v606_v24, %v219_v27  ;;  %vm66_vm0 = vcmp.eq.s32.totalorder %v632_v32, 0  ;;  %vm84_vm1 = vcmp.eq.s32.totalorder %v632_v32, 1  ;;  %vm102_vm2 = vcmp.eq.s32.totalorder %v632_v32, 4294967295  ;;  %p485_p9 = pnand %p484_p8, %p478_p5 }
  0x20   :  { %v255_v33 = vsel %vm245_vm10, %v613_v26, %v237_v30  ;;  %vm371_vm3 = vcmp.eq.s32.totalorder %v533_v3, 9  ;;  %v76_v37 = vsel %vm66_vm0, %v547_v4, 0.0  ;;  %vm120_vm4 = vcmp.eq.s32.totalorder %v632_v32, 2 }
  0x21   :  { %v273_v35 = vsel %vm263_vm11, %v618_v28, %v255_v33  ;;  %v656_v39 = vstv %s598_s28  ;;  %v94_v40 = vsel %vm84_vm1, %v554_v6, %v76_v37  ;;  %vm138_vm5 = vcmp.eq.s32.totalorder %v632_v32, 4294967294 }
  0x22   :  { %v291_v36 = vsel %vm281_vm12, %v622_v29, %v273_v35  ;;  %v662_v42 = vstv %s608_s29  ;;  %v112_v43 = vsel %vm102_vm2, %v562_v8, %v94_v40  ;;  %vm156_vm6 = vcmp.eq.s32.totalorder %v632_v32, 3 }
  0x23   :  { %v309_v38 = vsel %vm299_vm13, %v629_v31, %v291_v36  ;;  %v130_v45 = vsel %vm120_vm4, %v569_v11, %v112_v43  ;;  %vm174_vm7 = vcmp.eq.s32.totalorder %v632_v32, 4294967293  ;;  %v672_v46 = vsub.s32 %v527_v2, %v40_v12 }
  0x24   :  { %v327_v41 = vsel %vm317_vm14, %v639_v34, %v309_v38  ;;  %v148_v48 = vsel %vm138_vm5, %v576_v14, %v130_v45  ;;  %vm192_vm8 = vcmp.eq.s32.totalorder %v632_v32, 4  ;;  %v678_v49 = vstv %s624_s30 }
  0x25   :  { %v345_v44 = vsel %vm335_vm15, %v662_v42, %v327_v41  ;;  %v166_v50 = vsel %vm156_vm6, %v584_v17, %v148_v48  ;;  %vm210_vm9 = vcmp.eq.s32.totalorder %v632_v32, 4294967292  ;;  %vm228_vm10 = vcmp.eq.s32.totalorder %v632_v32, 5 }
  0x26   :  { %v381_v47 = vsel %vm371_vm3, %v656_v39, %v345_v44  ;;  %v684_v51 = vstv %s634_s3  ;;  %v184_v52 = vsel %vm174_vm7, %v592_v20, %v166_v50  ;;  %vm246_vm11 = vcmp.eq.s32.totalorder %v632_v32, 4294967291 }
  0x27   :  { %407 = vst [vmem:[#allocation6] sm:$0xff] %v381_v47  ;;  %vm264_vm12 = vcmp.eq.s32.totalorder %v632_v32, 6  ;;  %vm282_vm13 = vcmp.eq.s32.totalorder %v632_v32, 4294967290  ;;  %v202_v53 = vsel %vm192_vm8, %v595_v21, %v184_v52  ;;  %vm67_vm14 = vcmp.eq.s32.totalorder %v672_v46, 0 }
  0x28   :  { %vm85_vm15 = vcmp.eq.s32.totalorder %v672_v46, 1  ;;  %vm103_vm0 = vcmp.eq.s32.totalorder %v672_v46, 4294967295  ;;  %v220_v54 = vsel %vm210_vm9, %v602_v23, %v202_v53  ;;  %vm300_vm1 = vcmp.eq.s32.totalorder %v632_v32, 7 }
  0x29   :  { %v77_v55 = vsel %vm67_vm14, %v547_v4, 0.0  ;;  %vm121_vm2 = vcmp.eq.s32.totalorder %v672_v46, 2  ;;  %v238_v56 = vsel %vm228_vm10, %v606_v24, %v220_v54  ;;  %vm318_vm3 = vcmp.eq.s32.totalorder %v632_v32, 4294967289 }
  0x2a   :  { %v95_v57 = vsel %vm85_vm15, %v554_v6, %v77_v55  ;;  %vm139_vm4 = vcmp.eq.s32.totalorder %v672_v46, 4294967294  ;;  %v256_v58 = vsel %vm246_vm11, %v613_v26, %v238_v56  ;;  %vm336_vm5 = vcmp.eq.s32.totalorder %v632_v32, 8 }
  0x2b   :  { %v113_v59 = vsel %vm103_vm0, %v562_v8, %v95_v57  ;;  %vm157_vm6 = vcmp.eq.s32.totalorder %v672_v46, 3  ;;  %v274_v60 = vsel %vm264_vm12, %v618_v28, %v256_v58  ;;  %vm354_vm7 = vcmp.eq.s32.totalorder %v632_v32, 4294967288 }
  0x2c   :  { %v131_v61 = vsel %vm121_vm2, %v569_v11, %v113_v59  ;;  %vm175_vm8 = vcmp.eq.s32.totalorder %v672_v46, 4294967293  ;;  %v292_v62 = vsel %vm282_vm13, %v622_v29, %v274_v60  ;;  %vm372_vm9 = vcmp.eq.s32.totalorder %v632_v32, 9 }
  0x2d   :  { %v149_v63 = vsel %vm139_vm4, %v576_v14, %v131_v61  ;;  %vm193_vm10 = vcmp.eq.s32.totalorder %v672_v46, 4  ;;  %v310_v0 = vsel %vm300_vm1, %v629_v31, %v292_v62  ;;  %vm390_vm11 = vcmp.eq.s32.totalorder %v632_v32, 4294967287 }
  0x2e   :  { %v167_v3 = vsel %vm157_vm6, %v584_v17, %v149_v63  ;;  %vm211_vm12 = vcmp.eq.s32.totalorder %v672_v46, 4294967292  ;;  %v328_v5 = vsel %vm318_vm3, %v639_v34, %v310_v0  ;;  %vm229_vm13 = vcmp.eq.s32.totalorder %v672_v46, 5 }
  0x2f   :  { %v185_v7 = vsel %vm175_vm8, %v592_v20, %v167_v3  ;;  %vm247_vm14 = vcmp.eq.s32.totalorder %v672_v46, 4294967291  ;;  %v346_v9 = vsel %vm336_vm5, %v662_v42, %v328_v5  ;;  %vm265_vm15 = vcmp.eq.s32.totalorder %v672_v46, 6 }
  0x30   :  { %v203_v10 = vsel %vm193_vm10, %v595_v21, %v185_v7  ;;  %vm283_vm0 = vcmp.eq.s32.totalorder %v672_v46, 4294967290  ;;  %v364_v12 = vsel %vm354_vm7, %v678_v49, %v346_v9  ;;  %vm301_vm1 = vcmp.eq.s32.totalorder %v672_v46, 7 }
  0x31   :  { %v221_v13 = vsel %vm211_vm12, %v602_v23, %v203_v10  ;;  %v743_v16 = vsub.s32 %v527_v2, %v580_v15  ;;  %v382_v19 = vsel %vm372_vm9, %v656_v39, %v364_v12  ;;  %vm319_vm2 = vcmp.eq.s32.totalorder %v672_v46, 4294967289 }
  0x32   :  { %v239_v22 = vsel %vm229_vm13, %v606_v24, %v221_v13  ;;  %vm337_vm3 = vcmp.eq.s32.totalorder %v672_v46, 8  ;;  %v400_v25 = vsel %vm390_vm11, %v684_v51, %v382_v19  ;;  %vm355_vm8 = vcmp.eq.s32.totalorder %v672_v46, 4294967288 }
  0x33   :  { %v257_v27 = vsel %vm247_vm14, %v613_v26, %v239_v22  ;;  %vm68_vm4 = vcmp.eq.s32.totalorder %v743_v16, 0  ;;  %vm86_vm5 = vcmp.eq.s32.totalorder %v743_v16, 1  ;;  %408 = vst [vmem:[#allocation6 + $0x8] sm:$0xff] %v400_v25  ;;  %vm104_vm6 = vcmp.eq.s32.totalorder %v743_v16, 4294967295 }
  0x34   :  { %v275_v15 = vsel %vm265_vm15, %v618_v28, %v257_v27  ;;  %v78_v30 = vsel %vm68_vm4, %v547_v4, 0.0  ;;  %vm122_vm7 = vcmp.eq.s32.totalorder %v743_v16, 2  ;;  %vm140_vm9 = vcmp.eq.s32.totalorder %v743_v16, 4294967294 }
  0x35   :  { %v293_v32 = vsel %vm283_vm0, %v622_v29, %v275_v15  ;;  %v96_v33 = vsel %vm86_vm5, %v554_v6, %v78_v30  ;;  %vm373_vm10 = vcmp.eq.s32.totalorder %v672_v46, 9  ;;  %vm158_vm11 = vcmp.eq.s32.totalorder %v743_v16, 3 }
  0x36   :  { %v311_v35 = vsel %vm301_vm1, %v629_v31, %v293_v32  ;;  %v114_v36 = vsel %vm104_vm6, %v562_v8, %v96_v33  ;;  %vm391_vm12 = vcmp.eq.s32.totalorder %v672_v46, 4294967287  ;;  %vm176_vm13 = vcmp.eq.s32.totalorder %v743_v16, 4294967293 }
  0x37   :  { %v329_v37 = vsel %vm319_vm2, %v639_v34, %v311_v35  ;;  %v132_v38 = vsel %vm122_vm7, %v569_v11, %v114_v36  ;;  %vm194_vm14 = vcmp.eq.s32.totalorder %v743_v16, 4  ;;  %v786_v43 = vsub.s32 %v527_v2, %v588_v18 }
  0x38   :  { %v347_v40 = vsel %vm337_vm3, %v662_v42, %v329_v37  ;;  %v150_v41 = vsel %vm140_vm9, %v576_v14, %v132_v38  ;;  %vm212_vm15 = vcmp.eq.s32.totalorder %v743_v16, 4294967292  ;;  %v43_v47 = vadd.s32 40, %v525_v1 }
  0x39   :  { %v365_v44 = vsel %vm355_vm8, %v678_v49, %v347_v40  ;;  %v168_v45 = vsel %vm158_vm11, %v584_v17, %v150_v41  ;;  %vm230_vm0 = vcmp.eq.s32.totalorder %v743_v16, 5  ;;  %v796_v50 = vadd.s32 48, %v525_v1 }
  0x3a   :  { %v383_v48 = vsel %vm373_vm10, %v656_v39, %v365_v44  ;;  %v186_v46 = vsel %vm176_vm13, %v592_v20, %v168_v45  ;;  %vm248_vm1 = vcmp.eq.s32.totalorder %v743_v16, 4294967291  ;;  %vm266_vm2 = vcmp.eq.s32.totalorder %v743_v16, 6 }
  0x3b   :  { %v401_v18 = vsel %vm391_vm12, %v684_v51, %v383_v48  ;;  %v204_v52 = vsel %vm194_vm14, %v595_v21, %v186_v46  ;;  %vm284_vm3 = vcmp.eq.s32.totalorder %v743_v16, 4294967290  ;;  %vm69_vm4 = vcmp.eq.s32.totalorder %v786_v43, 0 }
  0x3c   :  { %409 = vst [vmem:[#allocation6 + $0x10] sm:$0xff] %v401_v18  ;;  %v222_v53 = vsel %vm212_vm15, %v602_v23, %v204_v52  ;;  %vm87_vm5 = vcmp.eq.s32.totalorder %v786_v43, 1  ;;  %v79_v55 = vsel %vm69_vm4, %v547_v4, 0.0  ;;  %vm105_vm6 = vcmp.eq.s32.totalorder %v786_v43, 4294967295 }
  0x3d   :  { %v240_v54 = vsel %vm230_vm0, %v606_v24, %v222_v53  ;;  %vm123_vm7 = vcmp.eq.s32.totalorder %v786_v43, 2  ;;  %vm302_vm8 = vcmp.eq.s32.totalorder %v743_v16, 7  ;;  %v97_v57 = vsel %vm87_vm5, %v554_v6, %v79_v55 }
  0x3e   :  { %v258_v56 = vsel %vm248_vm1, %v613_v26, %v240_v54  ;;  %vm141_vm9 = vcmp.eq.s32.totalorder %v786_v43, 4294967294  ;;  %vm320_vm10 = vcmp.eq.s32.totalorder %v743_v16, 4294967289  ;;  %v115_v59 = vsel %vm105_vm6, %v562_v8, %v97_v57 }
  0x3f   :  { %v276_v58 = vsel %vm266_vm2, %v618_v28, %v258_v56  ;;  %vm159_vm11 = vcmp.eq.s32.totalorder %v786_v43, 3  ;;  %vm338_vm12 = vcmp.eq.s32.totalorder %v743_v16, 8  ;;  %v133_v61 = vsel %vm123_vm7, %v569_v11, %v115_v59 }
  0x40   :  { %v294_v60 = vsel %vm284_vm3, %v622_v29, %v276_v58  ;;  %vm177_vm13 = vcmp.eq.s32.totalorder %v786_v43, 4294967293  ;;  %vm356_vm14 = vcmp.eq.s32.totalorder %v743_v16, 4294967288  ;;  %v151_v63 = vsel %vm141_vm9, %v576_v14, %v133_v61 }
  0x41   :  { %v312_v62 = vsel %vm302_vm8, %v629_v31, %v294_v60  ;;  %vm195_vm15 = vcmp.eq.s32.totalorder %v786_v43, 4  ;;  %vm374_vm0 = vcmp.eq.s32.totalorder %v743_v16, 9  ;;  %v169_v3 = vsel %vm159_vm11, %v584_v17, %v151_v63 }
  0x42   :  { %v330_v0 = vsel %vm320_vm10, %v639_v34, %v312_v62  ;;  %vm213_vm1 = vcmp.eq.s32.totalorder %v786_v43, 4294967292  ;;  %vm392_vm2 = vcmp.eq.s32.totalorder %v743_v16, 4294967287  ;;  %v187_v7 = vsel %vm177_vm13, %v592_v20, %v169_v3 }
  0x43   :  { %v348_v5 = vsel %vm338_vm12, %v662_v42, %v330_v0  ;;  %vm231_vm3 = vcmp.eq.s32.totalorder %v786_v43, 5  ;;  %v205_v10 = vsel %vm195_vm15, %v595_v21, %v187_v7  ;;  %vm249_vm4 = vcmp.eq.s32.totalorder %v786_v43, 4294967291 }
  0x44   :  { %v366_v9 = vsel %vm356_vm14, %v678_v49, %v348_v5  ;;  %vm267_vm5 = vcmp.eq.s32.totalorder %v786_v43, 6  ;;  %v223_v13 = vsel %vm213_vm1, %v602_v23, %v205_v10  ;;  %vm285_vm6 = vcmp.eq.s32.totalorder %v786_v43, 4294967290 }
  0x45   :  { %v384_v12 = vsel %vm374_vm0, %v656_v39, %v366_v9  ;;  %v842_v16 = vsub.s32 %v527_v2, %v43_v47  ;;  %v241_v22 = vsel %vm231_vm3, %v606_v24, %v223_v13  ;;  %vm303_vm7 = vcmp.eq.s32.totalorder %v786_v43, 7 }
  0x46   :  { %v402_v19 = vsel %vm392_vm2, %v684_v51, %v384_v12  ;;  %vm321_vm8 = vcmp.eq.s32.totalorder %v786_v43, 4294967289  ;;  %v259_v25 = vsel %vm249_vm4, %v613_v26, %v241_v22  ;;  %vm339_vm12 = vcmp.eq.s32.totalorder %v786_v43, 8 }
  0x47   :  { %410 = vst [vmem:[#allocation6 + $0x18] sm:$0xff] %v402_v19  ;;  %vm70_vm9 = vcmp.eq.s32.totalorder %v842_v16, 0  ;;  %vm88_vm10 = vcmp.eq.s32.totalorder %v842_v16, 1  ;;  %vm106_vm11 = vcmp.eq.s32.totalorder %v842_v16, 4294967295  ;;  %v277_v27 = vsel %vm267_vm5, %v618_v28, %v259_v25 }
  0x48   :  { %v80_v15 = vsel %vm70_vm9, %v547_v4, 0.0  ;;  %vm124_vm13 = vcmp.eq.s32.totalorder %v842_v16, 2  ;;  %v295_v30 = vsel %vm285_vm6, %v622_v29, %v277_v27  ;;  %vm357_vm14 = vcmp.eq.s32.totalorder %v786_v43, 4294967288 }
  0x49   :  { %v98_v32 = vsel %vm88_vm10, %v554_v6, %v80_v15  ;;  %vm142_vm15 = vcmp.eq.s32.totalorder %v842_v16, 4294967294  ;;  %v313_v33 = vsel %vm303_vm7, %v629_v31, %v295_v30  ;;  %vm375_vm0 = vcmp.eq.s32.totalorder %v786_v43, 9 }
  0x4a   :  { %v116_v35 = vsel %vm106_vm11, %v562_v8, %v98_v32  ;;  %vm160_vm1 = vcmp.eq.s32.totalorder %v842_v16, 3  ;;  %v331_v36 = vsel %vm321_vm8, %v639_v34, %v313_v33  ;;  %vm393_vm2 = vcmp.eq.s32.totalorder %v786_v43, 4294967287 }
  0x4b   :  { %v134_v37 = vsel %vm124_vm13, %v569_v11, %v116_v35  ;;  %vm178_vm3 = vcmp.eq.s32.totalorder %v842_v16, 4294967293  ;;  %v349_v38 = vsel %vm339_vm12, %v662_v42, %v331_v36  ;;  %vm196_vm4 = vcmp.eq.s32.totalorder %v842_v16, 4 }
  0x4c   :  { %v152_v40 = vsel %vm142_vm15, %v576_v14, %v134_v37  ;;  %v875_v41 = vsub.s32 %v527_v2, %v796_v50  ;;  %v367_v44 = vsel %vm357_vm14, %v678_v49, %v349_v38  ;;  %vm214_vm5 = vcmp.eq.s32.totalorder %v842_v16, 4294967292 }
  0x4d   :  { %v170_v45 = vsel %vm160_vm1, %v584_v17, %v152_v40  ;;  %v385_v43 = vsel %vm375_vm0, %v656_v39, %v367_v44  ;;  %vm232_vm6 = vcmp.eq.s32.totalorder %v842_v16, 5  ;;  %v45_v48 = vadd.s32 56, %v525_v1 }
  0x4e   :  { %v188_v47 = vsel %vm178_vm3, %v592_v20, %v170_v45  ;;  %v403_v46 = vsel %vm393_vm2, %v684_v51, %v385_v43  ;;  %vm250_vm7 = vcmp.eq.s32.totalorder %v842_v16, 4294967291  ;;  %vm268_vm8 = vcmp.eq.s32.totalorder %v842_v16, 6 }
  0x4f   :  { %v206_v18 = vsel %vm196_vm4, %v595_v21, %v188_v47  ;;  %411 = vst [vmem:[#allocation6 + $0x20] sm:$0xff] %v403_v46  ;;  %vm71_vm9 = vcmp.eq.s32.totalorder %v875_v41, 0  ;;  %vm89_vm10 = vcmp.eq.s32.totalorder %v875_v41, 1  ;;  %vm107_vm11 = vcmp.eq.s32.totalorder %v875_v41, 4294967295 }
  0x50   :  { %v224_v50 = vsel %vm214_vm5, %v602_v23, %v206_v18  ;;  %vm286_vm12 = vcmp.eq.s32.totalorder %v842_v16, 4294967290  ;;  %v81_v1 = vsel %vm71_vm9, %v547_v4, 0.0  ;;  %vm125_vm13 = vcmp.eq.s32.totalorder %v875_v41, 2 }
  0x51   :  { %v242_v52 = vsel %vm232_vm6, %v606_v24, %v224_v50  ;;  %vm304_vm14 = vcmp.eq.s32.totalorder %v842_v16, 7  ;;  %v99_v54 = vsel %vm89_vm10, %v554_v6, %v81_v1  ;;  %vm143_vm15 = vcmp.eq.s32.totalorder %v875_v41, 4294967294 }
  0x52   :  { %v260_v53 = vsel %vm250_vm7, %v613_v26, %v242_v52  ;;  %vm322_vm0 = vcmp.eq.s32.totalorder %v842_v16, 4294967289  ;;  %v117_v56 = vsel %vm107_vm11, %v562_v8, %v99_v54  ;;  %vm161_vm1 = vcmp.eq.s32.totalorder %v875_v41, 3 }
  0x53   :  { %v278_v55 = vsel %vm268_vm8, %v618_v28, %v260_v53  ;;  %vm340_vm2 = vcmp.eq.s32.totalorder %v842_v16, 8  ;;  %v135_v58 = vsel %vm125_vm13, %v569_v11, %v117_v56  ;;  %vm179_vm3 = vcmp.eq.s32.totalorder %v875_v41, 4294967293 }
  0x54   :  { %v296_v57 = vsel %vm286_vm12, %v622_v29, %v278_v55  ;;  %vm358_vm4 = vcmp.eq.s32.totalorder %v842_v16, 4294967288  ;;  %v153_v60 = vsel %vm143_vm15, %v576_v14, %v135_v58  ;;  %vm197_vm5 = vcmp.eq.s32.totalorder %v875_v41, 4 }
  0x55   :  { %v314_v59 = vsel %vm304_vm14, %v629_v31, %v296_v57  ;;  %vm376_vm6 = vcmp.eq.s32.totalorder %v842_v16, 9  ;;  %v171_v62 = vsel %vm161_vm1, %v584_v17, %v153_v60  ;;  %vm215_vm7 = vcmp.eq.s32.totalorder %v875_v41, 4294967292 }
  0x56   :  { %v332_v61 = vsel %vm322_vm0, %v639_v34, %v314_v59  ;;  %vm394_vm8 = vcmp.eq.s32.totalorder %v842_v16, 4294967287  ;;  %v189_v0 = vsel %vm179_vm3, %v592_v20, %v171_v62  ;;  %vm233_vm9 = vcmp.eq.s32.totalorder %v875_v41, 5 }
  0x57   :  { %v350_v63 = vsel %vm340_vm2, %v662_v42, %v332_v61  ;;  %v207_v5 = vsel %vm197_vm5, %v595_v21, %v189_v0  ;;  %vm251_vm10 = vcmp.eq.s32.totalorder %v875_v41, 4294967291  ;;  %vm269_vm11 = vcmp.eq.s32.totalorder %v875_v41, 6 }
  0x58   :  { %v368_v3 = vsel %vm358_vm4, %v678_v49, %v350_v63  ;;  %v225_v9 = vsel %vm215_vm7, %v602_v23, %v207_v5  ;;  %v927_v10 = vsub.s32 %v527_v2, %v45_v48  ;;  %vm287_vm12 = vcmp.eq.s32.totalorder %v875_v41, 4294967290 }
  0x59   :  { %v386_v7 = vsel %vm376_vm6, %v656_v39, %v368_v3  ;;  %v243_v13 = vsel %vm233_vm9, %v606_v24, %v225_v9  ;;  %vm305_vm13 = vcmp.eq.s32.totalorder %v875_v41, 7  ;;  %vm323_vm1 = vcmp.eq.s32.totalorder %v875_v41, 4294967289 }
  0x5a   :  { %v404_v12 = vsel %vm394_vm8, %v684_v51, %v386_v7  ;;  %v261_v16 = vsel %vm251_vm10, %v613_v26, %v243_v13  ;;  %vm72_vm14 = vcmp.eq.s32.totalorder %v927_v10, 0  ;;  %vm90_vm15 = vcmp.eq.s32.totalorder %v927_v10, 1 }
  0x5b   :  { %412 = vst [vmem:[#allocation6 + $0x28] sm:$0xff] %v404_v12  ;;  %vm108_vm0 = vcmp.eq.s32.totalorder %v927_v10, 4294967295  ;;  %v279_v2 = vsel %vm269_vm11, %v618_v28, %v261_v16  ;;  %v82_v19 = vsel %vm72_vm14, %v547_v4, 0.0  ;;  %vm126_vm2 = vcmp.eq.s32.totalorder %v927_v10, 2 }
  0x5c   :  { %v297_v22 = vsel %vm287_vm12, %v622_v29, %v279_v2  ;;  %vm341_vm3 = vcmp.eq.s32.totalorder %v875_v41, 8  ;;  %v100_v25 = vsel %vm90_vm15, %v554_v6, %v82_v19  ;;  %vm144_vm4 = vcmp.eq.s32.totalorder %v927_v10, 4294967294 }
  0x5d   :  { %v315_v27 = vsel %vm305_vm13, %v629_v31, %v297_v22  ;;  %vm359_vm5 = vcmp.eq.s32.totalorder %v875_v41, 4294967288  ;;  %v118_v15 = vsel %vm108_vm0, %v562_v8, %v100_v25  ;;  %vm162_vm6 = vcmp.eq.s32.totalorder %v927_v10, 3 }
  0x5e   :  { %v333_v4 = vsel %vm323_vm1, %v639_v34, %v315_v27  ;;  %vm377_vm7 = vcmp.eq.s32.totalorder %v875_v41, 9  ;;  %v136_v30 = vsel %vm126_vm2, %v569_v11, %v118_v15  ;;  %vm180_vm8 = vcmp.eq.s32.totalorder %v927_v10, 4294967293 }
  0x5f   :  { %v351_v6 = vsel %vm341_vm3, %v662_v42, %v333_v4  ;;  %vm395_vm9 = vcmp.eq.s32.totalorder %v875_v41, 4294967287  ;;  %v154_v32 = vsel %vm144_vm4, %v576_v14, %v136_v30  ;;  %vm198_vm10 = vcmp.eq.s32.totalorder %v927_v10, 4 }
  0x60   :  { %v369_v8 = vsel %vm359_vm5, %v678_v49, %v351_v6  ;;  %v172_v33 = vsel %vm162_vm6, %v584_v17, %v154_v32  ;;  %vm216_vm11 = vcmp.eq.s32.totalorder %v927_v10, 4294967292  ;;  %vm234_vm12 = vcmp.eq.s32.totalorder %v927_v10, 5 }
  0x61   :  { %v387_v35 = vsel %vm377_vm7, %v656_v39, %v369_v8  ;;  %v190_v11 = vsel %vm180_vm8, %v592_v20, %v172_v33  ;;  %vm252_vm13 = vcmp.eq.s32.totalorder %v927_v10, 4294967291  ;;  %vm270_vm14 = vcmp.eq.s32.totalorder %v927_v10, 6 }
  0x62   :  { %v405_v36 = vsel %vm395_vm9, %v684_v51, %v387_v35  ;;  %v208_v37 = vsel %vm198_vm10, %v595_v21, %v190_v11  ;;  %vm288_vm15 = vcmp.eq.s32.totalorder %v927_v10, 4294967290  ;;  %vm306_vm0 = vcmp.eq.s32.totalorder %v927_v10, 7 }
  0x63   :  { %413 = vst [vmem:[#allocation6 + $0x30] sm:$0xff] %v405_v36  ;;  %v226_v14 = vsel %vm216_vm11, %v602_v23, %v208_v37  ;;  %vm324_vm1 = vcmp.eq.s32.totalorder %v927_v10, 4294967289  ;;  %vm342_vm2 = vcmp.eq.s32.totalorder %v927_v10, 8  ;;  %vm360_vm3 = vcmp.eq.s32.totalorder %v927_v10, 4294967288 }
  0x64   :  { %v244_v17 = vsel %vm234_vm12, %v606_v24, %v226_v14  ;;  %vm378_vm4 = vcmp.eq.s32.totalorder %v927_v10, 9  ;;  %vm396_vm5 = vcmp.eq.s32.totalorder %v927_v10, 4294967287 }
  0x65   :  { %v262_v38 = vsel %vm252_vm13, %v613_v26, %v244_v17 }
  0x66   :  { %v280_v20 = vsel %vm270_vm14, %v618_v28, %v262_v38 }
  0x67   :  { %v298_v21 = vsel %vm288_vm15, %v622_v29, %v280_v20 }
  0x68   :  { %v316_v23 = vsel %vm306_vm0, %v629_v31, %v298_v21 }
  0x69   :  { %v334_v24 = vsel %vm324_vm1, %v639_v34, %v316_v23 }
  0x6a   :  { %v352_v26 = vsel %vm342_vm2, %v662_v42, %v334_v24 }
  0x6b   :  { %v370_v28 = vsel %vm360_vm3, %v678_v49, %v352_v26 }
  0x6c   :  { %v388_v29 = vsel %vm378_vm4, %v656_v39, %v370_v28 }
  0x6d   :  { %v406_v40 = vsel %vm396_vm5, %v684_v51, %v388_v29 }
  0x6e   :  { %414 = vst [vmem:[#allocation6 + $0x38] sm:$0xff] %v406_v40 }
  0x6f   :  { %488 = shalt.err (!%p485_p9)
}
  0x70   :  { %s489_s9 = scalar_lea.hbm %s999_s2, 1024 }
  0x71   :  { %p490_p10 = scmp.ne.s32.totalorder %s999_s2, %s489_s9  ;;  %p493_p11 = scmp.lt.u32.totalorder %s489_s9, %s999_s2 }
  0x73   :  { %p495_p12 = pnand %p493_p11, %p490_p10 }
  0x75   :  { %498 = shalt.err (!%p495_p12)
}
  0x76   :  { %s505_s14 = smov 128   ;;  %s506_s15 = smov 8  }
  0x77   :  { %437 = dma.vmem_to_hbm [thread:$0]  %s432_s5, 1024, %s999_s2, [#allocation4], %s505_s14, %s505_s14, %s506_s15  }
  0x78   :  { %501 = dma.done.wait [#allocation4], 1024  }
  0x79   :  { %502 = vsyncadd [#allocation4], 4294966272 }
  0x7a   :  { %441 = vsyncpa [#allocation4], 1 }
  0x7b   :  { %442 = vsyncpa [#allocation5], 1 }

</bundles_post_ra>
